<compile_context>
chip_gen: v6e
topology: v6e:2x2x1
jax: 0.10.0
libtpu: 0.0.40
codegen_flags: <defaults>
</compile_context>

<pallas_src>
import functools
import math

import jax
import jax.numpy as jnp
import numpy as np
from jax import lax
from jax.experimental import pallas as pl
from jax.experimental.pallas import tpu as pltpu


def _round_up(x, m):
    return ((x + m - 1) // m) * m


def _mam_fc_kernel(x_ref, w_ref, b_ref, o_ref, max_ref, min_ref, *acc_scratch,
                   beta, tk, rem, m_sub, n_sub, compute_dtype):
    """Computes one (tm, tn) output tile; grid axis 2 walks K in tk chunks."""
    kb = pl.program_id(2)
    nk = pl.num_programs(2)
    tm, tn = o_ref.shape
    acc_ref = acc_scratch[0] if acc_scratch else None

    @pl.when(kb == 0)
    def _init():
        max_ref[...] = jnp.full((tm, tn), -jnp.inf, max_ref.dtype)
        min_ref[...] = jnp.full((tm, tn), jnp.inf, min_ref.dtype)
        if acc_ref is not None:
            acc_ref[...] = jnp.zeros((tm, tn), acc_ref.dtype)

    def sweep(n_elems):
        # Register-budget-aware running max/min: iterate over (m_sub, n_sub)
        # strips so the live set (2 accumulators + 1 product slab + one
        # 128-wide x group) stays well inside the 64-vreg file; max_ref /
        # min_ref are touched once per strip per K block (no full-tile hoist).
        for i0 in range(0, tm, m_sub):
            for j0 in range(0, tn, n_sub):
                run_max = max_ref[i0:i0 + m_sub, j0:j0 + n_sub]
                run_min = min_ref[i0:i0 + m_sub, j0:j0 + n_sub]
                for k0 in range(0, n_elems, 128):
                    kg = min(128, n_elems - k0)
                    # One lane-group of x kept in vregs; w rows are streamed
                    # per k from VMEM (1 vld + sublane broadcast each).
                    x_grp = x_ref[i0:i0 + m_sub,
                                  k0:k0 + kg].astype(compute_dtype)
                    for kk in range(kg):
                        w_row = w_ref[k0 + kk:k0 + kk + 1,
                                      j0:j0 + n_sub].astype(compute_dtype)
                        p = x_grp[:, kk:kk + 1] * w_row      # (m_sub, n_sub)
                        run_max = jnp.maximum(run_max, p)
                        run_min = jnp.minimum(run_min, p)
                max_ref[i0:i0 + m_sub, j0:j0 + n_sub] = run_max
                min_ref[i0:i0 + m_sub, j0:j0 + n_sub] = run_min

    if rem == tk:
        sweep(tk)
    else:
        # Only the last K block holds `rem` valid elements; the zero padding
        # beyond them must never pollute max / min.
        @pl.when(kb < nk - 1)
        def _full():
            sweep(tk)

        @pl.when(kb == nk - 1)
        def _tail():
            sweep(rem)

    if acc_ref is not None:
        # Vanishing-contribution term (beta != 0) needs the full dot product;
        # the MXU accumulate rides for free under the VALU-bound sweep.
        # Padded K rows/cols are zero, so they contribute nothing.
        prec = None if compute_dtype == jnp.bfloat16 else lax.Precision.HIGHEST
        acc_ref[...] += jnp.dot(x_ref[...], w_ref[...],
                                preferred_element_type=jnp.float32,
                                precision=prec)

    @pl.when(kb == nk - 1)
    def _finalize():
        mx = max_ref[...].astype(jnp.float32)
        mn = min_ref[...].astype(jnp.float32)
        out = mx + mn + b_ref[...]
        if acc_ref is not None:
            out = out + beta * (acc_ref[...] - mx - mn)
        o_ref[...] = out.astype(o_ref.dtype)


def prepare_mam_params(weight, bias=None, *, tn=128, tk=256):
    """One-time parameter prep (do at parameter-setup time, not per call):
    transpose weight (N,K)->(K,N) and zero-pad weight / bias to tile multiples.
    """
    N, K = weight.shape
    tn_eff = min(tn, _round_up(N, 128))            # always a multiple of 128
    tk_eff = K if K <= tk else _round_up(tk, 128)  # full K or 128-aligned
    n_pad = _round_up(N, tn_eff)
    k_pad = _round_up(K, tk_eff)

    w_p = jnp.pad(jnp.transpose(weight), ((0, k_pad - K), (0, n_pad - N)))
    b = jnp.zeros((N,), jnp.float32) if bias is None else bias.astype(jnp.float32)
    b_p = jnp.pad(b, (0, n_pad - N)).reshape(1, n_pad)
    return dict(w=w_p, b=b_p, in_features=K, out_features=N,
                tn=tn_eff, tk=tk_eff)


def mam_fully_connected_prepared(x, params, beta=0.0, *,
                                 tm=128, m_sub=64, n_sub=128):
    """MAM fully-connected forward using pre-transposed / pre-padded params."""
    K = params["in_features"]
    N = params["out_features"]
    w_p, b_p = params["w"], params["b"]
    tn, tk = params["tn"], params["tk"]
    k_pad, n_pad = w_p.shape

    orig_shape = x.shape
    assert orig_shape[-1] == K
    x_flat = x.reshape(-1, K)
    M = x_flat.shape[0]

    tm = min(tm, _round_up(M, 8))
    m_pad = _round_up(M, tm)
    # v7x has 2 TensorCores per chip: ensure >=2 tiles along a "parallel"
    # grid axis for small problems so both cores get work.
    if (m_pad // tm) * (n_pad // tn) < 2 and m_pad >= 16:
        tm = m_pad // 2 if (m_pad // 2) % 8 == 0 else 8

    m_sub = min(m_sub, tm)
    if tm % m_sub:
        m_sub = tm
    n_sub = min(n_sub, tn)     # tn is a multiple of 128, so n_sub=128 divides

    nk = k_pad // tk
    rem = K - (nk - 1) * tk    # valid elements in the last K block

    # bf16 VALU sweep on v6e/v7x when both operands are bf16 (2x throughput,
    # half the vreg footprint); otherwise f32.
    compute_dtype = (jnp.bfloat16
                     if (x.dtype == jnp.bfloat16 and w_p.dtype == jnp.bfloat16)
                     else jnp.float32)

    x_p = jnp.pad(x_flat, ((0, m_pad - M), (0, k_pad - K)))

    scratch_shapes = [
        pltpu.VMEM((tm, tn), compute_dtype),      # running max
        pltpu.VMEM((tm, tn), compute_dtype),      # running min
    ]
    if beta != 0.0:
        scratch_shapes.append(pltpu.VMEM((tm, tn), jnp.float32))  # dot acc

    # VMEM footprint (double-buffered I/O + scratch); only raise the scoped
    # limit when needed, capped to this chip's capacity (v7x: 64 MiB/TC).
    isz = jnp.dtype(x.dtype).itemsize
    vmem_need = (2 * tm * tk * isz + 2 * tk * tn * w_p.dtype.itemsize
                 + 2 * tn * 4 + 2 * tm * tn * isz
                 + len(scratch_shapes) * tm * tn * 4)
    vmem_limit = None
    if vmem_need > 24 * 1024 * 1024:
        try:
            cap = int(pltpu.get_tpu_info().vmem_capacity_bytes)
        except Exception:
            cap = 64 * 1024 * 1024
        vmem_limit = min(int(vmem_need * 5 // 4), cap - 16 * 1024 * 1024)

    flops = 3 * M * K * N + (2 * M * K * N if beta != 0.0 else 0)
    bytes_accessed = isz * (M * K * (n_pad // tn) + K * N * (m_pad // tm)
                            + M * N)

    kernel = functools.partial(
        _mam_fc_kernel, beta=float(beta), tk=tk, rem=rem,
        m_sub=m_sub, n_sub=n_sub, compute_dtype=compute_dtype)

    out_p = pl.pallas_call(
        kernel,
        out_shape=jax.ShapeDtypeStruct((m_pad, n_pad), x.dtype),
        grid_spec=pltpu.PrefetchScalarGridSpec(
            num_scalar_prefetch=0,
            grid=(m_pad // tm, n_pad // tn, nk),
            in_specs=[
                pl.BlockSpec((tm, tk), lambda i, j, k: (i, k)),
                pl.BlockSpec((tk, tn), lambda i, j, k: (k, j)),
                pl.BlockSpec((1, tn), lambda i, j, k: (0, j)),
            ],
            out_specs=pl.BlockSpec((tm, tn), lambda i, j, k: (i, j)),
            scratch_shapes=scratch_shapes,
        ),
        compiler_params=pltpu.CompilerParams(
            dimension_semantics=("parallel", "parallel", "arbitrary"),
            vmem_limit_bytes=vmem_limit,
        ),
        cost_estimate=pl.CostEstimate(
            flops=flops, transcendentals=0, bytes_accessed=bytes_accessed),
    )(x_p, w_p, b_p)

    return out_p[:M, :N].reshape(orig_shape[:-1] + (N,))


def mam_fully_connected(x, weight, bias=None, beta=0.0, **kw):
    """One-shot convenience wrapper; for repeated calls use
    prepare_mam_params() once and mam_fully_connected_prepared()."""
    params = prepare_mam_params(weight, bias)
    return mam_fully_connected_prepared(x, params, beta, **kw)


def _reference(x, weight, bias, beta):
    x_flat = x.reshape(-1, x.shape[-1]).astype(jnp.float32)
    w = jnp.transpose(weight).astype(jnp.float32)           # (K, N)
    prod = x_flat[:, :, None] * w[None, :, :]
    mx = jnp.max(prod, axis=1)
    mn = jnp.min(prod, axis=1)
    s = jnp.einsum("mk,kn->mn", x_flat, w, precision=lax.Precision.HIGHEST)
    b = jnp.zeros((weight.shape[0],), jnp.float32) if bias is None else bias
    out = mx + mn + beta * (s - mx - mn) + b[None, :]
    return out.reshape(x.shape[:-1] + (weight.shape[0],))


if __name__ == "__main__":
    # Small shapes: batch=2, seq=8, in_features=32, out_features=64.
    batch, seq, in_features, out_features = 2, 8, 32, 64

    key = jax.random.PRNGKey(0)
    kx, kw, kb = jax.random.split(key, 3)

    # reset_parameters(): kaiming_uniform_(a=sqrt(5)) => U(-1/sqrt(fan_in), ...)
    bound = 1.0 / math.sqrt(in_features)
    weight = jax.random.uniform(kw, (out_features, in_features),
                                minval=-bound, maxval=bound, dtype=jnp.float32)
    bias = jax.random.uniform(kb, (out_features,),
                              minval=-bound, maxval=bound, dtype=jnp.float32)
    x = jax.random.normal(kx, (batch, seq, in_features), dtype=jnp.float32)

    params = prepare_mam_params(weight, bias)

    # Default ctor (vcon_steps=0) -> beta = 0: pure max+min MAM forward.
    out0 = jax.block_until_ready(
        mam_fully_connected_prepared(x, params, beta=0.0))
    ref0 = _reference(x, weight, bias, 0.0)
    np.testing.assert_allclose(np.asarray(out0), np.asarray(ref0),
                               rtol=1e-5, atol=1e-5)
    assert out0.shape == (batch, seq, out_features)

    # Mid-annealing beta exercises the fused MXU dot path.
    out1 = jax.block_until_ready(
        mam_fully_connected_prepared(x, params, beta=0.5))
    ref1 = _reference(x, weight, bias, 0.5)
    np.testing.assert_allclose(np.asarray(out1), np.asarray(ref1),
                               rtol=1e-5, atol=1e-5)

    print("KERNEL_OK")
</pallas_src>

<mosaic_0001>
module attributes {stable_mosaic.version = 11 : i64} {
  func.func @_mam_fc_kernel(%arg0: i32, %arg1: i32, %arg2: i32, %arg3: memref<8x32xf32, #tpu.memory_space<vmem>>, %arg4: memref<32x128xf32, #tpu.memory_space<vmem>>, %arg5: memref<1x128xf32, #tpu.memory_space<vmem>>, %arg6: memref<8x128xf32, #tpu.memory_space<vmem>>, %arg7: memref<8x128xf32, #tpu.memory_space<vmem>>, %arg8: memref<8x128xf32, #tpu.memory_space<vmem>>) attributes {dimension_semantics = [#tpu.dimension_semantics<parallel>, #tpu.dimension_semantics<parallel>, #tpu.dimension_semantics<arbitrary>], iteration_bounds = array<i64: 2, 1, 1>, scalar_prefetch = 0 : i64, scratch_operands = 2 : i64, tpu.core_type = #tpu.core_type<tc>, window_params = [{transform_indices = @transform_0, window_bounds = array<i64: 8, 32>}, {transform_indices = @transform_1, window_bounds = array<i64: 32, 128>}, {transform_indices = @transform_2, window_bounds = array<i64: 1, 128>}, {transform_indices = @transform_3, window_bounds = array<i64: 8, 128>}]} {
    %c0_i32 = arith.constant 0 : i32
    %0 = arith.cmpi eq, %arg2, %c0_i32 : i32
    %1 = arith.extui %0 : i1 to i32
    %c0_i32_0 = arith.constant 0 : i32
    %2 = arith.cmpi ne, %1, %c0_i32_0 : i32
    scf.if %2 {
      %cst = arith.constant 0xFF800000 : f32
      %235 = vector.broadcast %cst : f32 to vector<8x128xf32>
      %c0_45 = arith.constant 0 : index
      %c0_46 = arith.constant 0 : index
      %236 = vector.load %arg7[%c0_45, %c0_46] : memref<8x128xf32, #tpu.memory_space<vmem>>, vector<8x128xf32>
      tpu.vector_store %arg7[%c0_45, %c0_46], %235 {strides = array<i32>} : memref<8x128xf32, #tpu.memory_space<vmem>>, vector<8x128xf32>,
      %cst_47 = arith.constant 0x7F800000 : f32
      %237 = vector.broadcast %cst_47 : f32 to vector<8x128xf32>
      %c0_48 = arith.constant 0 : index
      %c0_49 = arith.constant 0 : index
      %238 = vector.load %arg8[%c0_48, %c0_49] : memref<8x128xf32, #tpu.memory_space<vmem>>, vector<8x128xf32>
      tpu.vector_store %arg8[%c0_48, %c0_49], %237 {strides = array<i32>} : memref<8x128xf32, #tpu.memory_space<vmem>>, vector<8x128xf32>,
    } else {
    }
    %c0 = arith.constant 0 : index
    %c0_1 = arith.constant 0 : index
    %3 = vector.load %arg7[%c0, %c0_1] : memref<8x128xf32, #tpu.memory_space<vmem>>, vector<8x128xf32>
    %c0_2 = arith.constant 0 : index
    %c0_3 = arith.constant 0 : index
    %4 = vector.load %arg8[%c0_2, %c0_3] : memref<8x128xf32, #tpu.memory_space<vmem>>, vector<8x128xf32>
    %c0_4 = arith.constant 0 : index
    %c0_5 = arith.constant 0 : index
    %5 = vector.load %arg3[%c0_4, %c0_5] : memref<8x32xf32, #tpu.memory_space<vmem>>, vector<8x32xf32>
    %c0_6 = arith.constant 0 : index
    %c0_7 = arith.constant 0 : index
    %6 = vector.load %arg4[%c0_6, %c0_7] : memref<32x128xf32, #tpu.memory_space<vmem>>, vector<1x128xf32>
    %7 = vector.extract_strided_slice %5 {offsets = [0, 0], sizes = [8, 1], strides = [1, 1]} : vector<8x32xf32> to vector<8x1xf32>
    %8 = vector.broadcast %7 : vector<8x1xf32> to vector<8x128xf32>
    %9 = vector.broadcast %6 : vector<1x128xf32> to vector<8x128xf32>
    %10 = arith.mulf %8, %9 : vector<8x128xf32>
    %11 = arith.maximumf %3, %10 : vector<8x128xf32>
    %12 = arith.minimumf %4, %10 : vector<8x128xf32>
    %c1 = arith.constant 1 : index
    %c0_8 = arith.constant 0 : index
    %13 = vector.load %arg4[%c1, %c0_8] : memref<32x128xf32, #tpu.memory_space<vmem>>, vector<1x128xf32>
    %14 = vector.extract_strided_slice %5 {offsets = [0, 1], sizes = [8, 1], strides = [1, 1]} : vector<8x32xf32> to vector<8x1xf32>
    %15 = vector.broadcast %14 : vector<8x1xf32> to vector<8x128xf32>
    %16 = vector.broadcast %13 : vector<1x128xf32> to vector<8x128xf32>
    %17 = arith.mulf %15, %16 : vector<8x128xf32>
    %18 = arith.maximumf %11, %17 : vector<8x128xf32>
    %19 = arith.minimumf %12, %17 : vector<8x128xf32>
    %c2 = arith.constant 2 : index
    %c0_9 = arith.constant 0 : index
    %20 = vector.load %arg4[%c2, %c0_9] : memref<32x128xf32, #tpu.memory_space<vmem>>, vector<1x128xf32>
    %21 = vector.extract_strided_slice %5 {offsets = [0, 2], sizes = [8, 1], strides = [1, 1]} : vector<8x32xf32> to vector<8x1xf32>
    %22 = vector.broadcast %21 : vector<8x1xf32> to vector<8x128xf32>
    %23 = vector.broadcast %20 : vector<1x128xf32> to vector<8x128xf32>
    %24 = arith.mulf %22, %23 : vector<8x128xf32>
    %25 = arith.maximumf %18, %24 : vector<8x128xf32>
    %26 = arith.minimumf %19, %24 : vector<8x128xf32>
    %c3 = arith.constant 3 : index
    %c0_10 = arith.constant 0 : index
    %27 = vector.load %arg4[%c3, %c0_10] : memref<32x128xf32, #tpu.memory_space<vmem>>, vector<1x128xf32>
    %28 = vector.extract_strided_slice %5 {offsets = [0, 3], sizes = [8, 1], strides = [1, 1]} : vector<8x32xf32> to vector<8x1xf32>
    %29 = vector.broadcast %28 : vector<8x1xf32> to vector<8x128xf32>
    %30 = vector.broadcast %27 : vector<1x128xf32> to vector<8x128xf32>
    %31 = arith.mulf %29, %30 : vector<8x128xf32>
    %32 = arith.maximumf %25, %31 : vector<8x128xf32>
    %33 = arith.minimumf %26, %31 : vector<8x128xf32>
    %c4 = arith.constant 4 : index
    %c0_11 = arith.constant 0 : index
    %34 = vector.load %arg4[%c4, %c0_11] : memref<32x128xf32, #tpu.memory_space<vmem>>, vector<1x128xf32>
    %35 = vector.extract_strided_slice %5 {offsets = [0, 4], sizes = [8, 1], strides = [1, 1]} : vector<8x32xf32> to vector<8x1xf32>
    %36 = vector.broadcast %35 : vector<8x1xf32> to vector<8x128xf32>
    %37 = vector.broadcast %34 : vector<1x128xf32> to vector<8x128xf32>
    %38 = arith.mulf %36, %37 : vector<8x128xf32>
    %39 = arith.maximumf %32, %38 : vector<8x128xf32>
    %40 = arith.minimumf %33, %38 : vector<8x128xf32>
    %c5 = arith.constant 5 : index
    %c0_12 = arith.constant 0 : index
    %41 = vector.load %arg4[%c5, %c0_12] : memref<32x128xf32, #tpu.memory_space<vmem>>, vector<1x128xf32>
    %42 = vector.extract_strided_slice %5 {offsets = [0, 5], sizes = [8, 1], strides = [1, 1]} : vector<8x32xf32> to vector<8x1xf32>
    %43 = vector.broadcast %42 : vector<8x1xf32> to vector<8x128xf32>
    %44 = vector.broadcast %41 : vector<1x128xf32> to vector<8x128xf32>
    %45 = arith.mulf %43, %44 : vector<8x128xf32>
    %46 = arith.maximumf %39, %45 : vector<8x128xf32>
    %47 = arith.minimumf %40, %45 : vector<8x128xf32>
    %c6 = arith.constant 6 : index
    %c0_13 = arith.constant 0 : index
    %48 = vector.load %arg4[%c6, %c0_13] : memref<32x128xf32, #tpu.memory_space<vmem>>, vector<1x128xf32>
    %49 = vector.extract_strided_slice %5 {offsets = [0, 6], sizes = [8, 1], strides = [1, 1]} : vector<8x32xf32> to vector<8x1xf32>
    %50 = vector.broadcast %49 : vector<8x1xf32> to vector<8x128xf32>
    %51 = vector.broadcast %48 : vector<1x128xf32> to vector<8x128xf32>
    %52 = arith.mulf %50, %51 : vector<8x128xf32>
    %53 = arith.maximumf %46, %52 : vector<8x128xf32>
    %54 = arith.minimumf %47, %52 : vector<8x128xf32>
    %c7 = arith.constant 7 : index
    %c0_14 = arith.constant 0 : index
    %55 = vector.load %arg4[%c7, %c0_14] : memref<32x128xf32, #tpu.memory_space<vmem>>, vector<1x128xf32>
    %56 = vector.extract_strided_slice %5 {offsets = [0, 7], sizes = [8, 1], strides = [1, 1]} : vector<8x32xf32> to vector<8x1xf32>
    %57 = vector.broadcast %56 : vector<8x1xf32> to vector<8x128xf32>
    %58 = vector.broadcast %55 : vector<1x128xf32> to vector<8x128xf32>
    %59 = arith.mulf %57, %58 : vector<8x128xf32>
    %60 = arith.maximumf %53, %59 : vector<8x128xf32>
    %61 = arith.minimumf %54, %59 : vector<8x128xf32>
    %c8 = arith.constant 8 : index
    %c0_15 = arith.constant 0 : index
    %62 = vector.load %arg4[%c8, %c0_15] : memref<32x128xf32, #tpu.memory_space<vmem>>, vector<1x128xf32>
    %63 = vector.extract_strided_slice %5 {offsets = [0, 8], sizes = [8, 1], strides = [1, 1]} : vector<8x32xf32> to vector<8x1xf32>
    %64 = vector.broadcast %63 : vector<8x1xf32> to vector<8x128xf32>
    %65 = vector.broadcast %62 : vector<1x128xf32> to vector<8x128xf32>
    %66 = arith.mulf %64, %65 : vector<8x128xf32>
    %67 = arith.maximumf %60, %66 : vector<8x128xf32>
    %68 = arith.minimumf %61, %66 : vector<8x128xf32>
    %c9 = arith.constant 9 : index
    %c0_16 = arith.constant 0 : index
    %69 = vector.load %arg4[%c9, %c0_16] : memref<32x128xf32, #tpu.memory_space<vmem>>, vector<1x128xf32>
    %70 = vector.extract_strided_slice %5 {offsets = [0, 9], sizes = [8, 1], strides = [1, 1]} : vector<8x32xf32> to vector<8x1xf32>
    %71 = vector.broadcast %70 : vector<8x1xf32> to vector<8x128xf32>
    %72 = vector.broadcast %69 : vector<1x128xf32> to vector<8x128xf32>
    %73 = arith.mulf %71, %72 : vector<8x128xf32>
    %74 = arith.maximumf %67, %73 : vector<8x128xf32>
    %75 = arith.minimumf %68, %73 : vector<8x128xf32>
    %c10 = arith.constant 10 : index
    %c0_17 = arith.constant 0 : index
    %76 = vector.load %arg4[%c10, %c0_17] : memref<32x128xf32, #tpu.memory_space<vmem>>, vector<1x128xf32>
    %77 = vector.extract_strided_slice %5 {offsets = [0, 10], sizes = [8, 1], strides = [1, 1]} : vector<8x32xf32> to vector<8x1xf32>
    %78 = vector.broadcast %77 : vector<8x1xf32> to vector<8x128xf32>
    %79 = vector.broadcast %76 : vector<1x128xf32> to vector<8x128xf32>
    %80 = arith.mulf %78, %79 : vector<8x128xf32>
    %81 = arith.maximumf %74, %80 : vector<8x128xf32>
    %82 = arith.minimumf %75, %80 : vector<8x128xf32>
    %c11 = arith.constant 11 : index
    %c0_18 = arith.constant 0 : index
    %83 = vector.load %arg4[%c11, %c0_18] : memref<32x128xf32, #tpu.memory_space<vmem>>, vector<1x128xf32>
    %84 = vector.extract_strided_slice %5 {offsets = [0, 11], sizes = [8, 1], strides = [1, 1]} : vector<8x32xf32> to vector<8x1xf32>
    %85 = vector.broadcast %84 : vector<8x1xf32> to vector<8x128xf32>
    %86 = vector.broadcast %83 : vector<1x128xf32> to vector<8x128xf32>
    %87 = arith.mulf %85, %86 : vector<8x128xf32>
    %88 = arith.maximumf %81, %87 : vector<8x128xf32>
    %89 = arith.minimumf %82, %87 : vector<8x128xf32>
    %c12 = arith.constant 12 : index
    %c0_19 = arith.constant 0 : index
    %90 = vector.load %arg4[%c12, %c0_19] : memref<32x128xf32, #tpu.memory_space<vmem>>, vector<1x128xf32>
    %91 = vector.extract_strided_slice %5 {offsets = [0, 12], sizes = [8, 1], strides = [1, 1]} : vector<8x32xf32> to vector<8x1xf32>
    %92 = vector.broadcast %91 : vector<8x1xf32> to vector<8x128xf32>
    %93 = vector.broadcast %90 : vector<1x128xf32> to vector<8x128xf32>
    %94 = arith.mulf %92, %93 : vector<8x128xf32>
    %95 = arith.maximumf %88, %94 : vector<8x128xf32>
    %96 = arith.minimumf %89, %94 : vector<8x128xf32>
    %c13 = arith.constant 13 : index
    %c0_20 = arith.constant 0 : index
    %97 = vector.load %arg4[%c13, %c0_20] : memref<32x128xf32, #tpu.memory_space<vmem>>, vector<1x128xf32>
    %98 = vector.extract_strided_slice %5 {offsets = [0, 13], sizes = [8, 1], strides = [1, 1]} : vector<8x32xf32> to vector<8x1xf32>
    %99 = vector.broadcast %98 : vector<8x1xf32> to vector<8x128xf32>
    %100 = vector.broadcast %97 : vector<1x128xf32> to vector<8x128xf32>
    %101 = arith.mulf %99, %100 : vector<8x128xf32>
    %102 = arith.maximumf %95, %101 : vector<8x128xf32>
    %103 = arith.minimumf %96, %101 : vector<8x128xf32>
    %c14 = arith.constant 14 : index
    %c0_21 = arith.constant 0 : index
    %104 = vector.load %arg4[%c14, %c0_21] : memref<32x128xf32, #tpu.memory_space<vmem>>, vector<1x128xf32>
    %105 = vector.extract_strided_slice %5 {offsets = [0, 14], sizes = [8, 1], strides = [1, 1]} : vector<8x32xf32> to vector<8x1xf32>
    %106 = vector.broadcast %105 : vector<8x1xf32> to vector<8x128xf32>
    %107 = vector.broadcast %104 : vector<1x128xf32> to vector<8x128xf32>
    %108 = arith.mulf %106, %107 : vector<8x128xf32>
    %109 = arith.maximumf %102, %108 : vector<8x128xf32>
    %110 = arith.minimumf %103, %108 : vector<8x128xf32>
    %c15 = arith.constant 15 : index
    %c0_22 = arith.constant 0 : index
    %111 = vector.load %arg4[%c15, %c0_22] : memref<32x128xf32, #tpu.memory_space<vmem>>, vector<1x128xf32>
    %112 = vector.extract_strided_slice %5 {offsets = [0, 15], sizes = [8, 1], strides = [1, 1]} : vector<8x32xf32> to vector<8x1xf32>
    %113 = vector.broadcast %112 : vector<8x1xf32> to vector<8x128xf32>
    %114 = vector.broadcast %111 : vector<1x128xf32> to vector<8x128xf32>
    %115 = arith.mulf %113, %114 : vector<8x128xf32>
    %116 = arith.maximumf %109, %115 : vector<8x128xf32>
    %117 = arith.minimumf %110, %115 : vector<8x128xf32>
    %c16 = arith.constant 16 : index
    %c0_23 = arith.constant 0 : index
    %118 = vector.load %arg4[%c16, %c0_23] : memref<32x128xf32, #tpu.memory_space<vmem>>, vector<1x128xf32>
    %119 = vector.extract_strided_slice %5 {offsets = [0, 16], sizes = [8, 1], strides = [1, 1]} : vector<8x32xf32> to vector<8x1xf32>
    %120 = vector.broadcast %119 : vector<8x1xf32> to vector<8x128xf32>
    %121 = vector.broadcast %118 : vector<1x128xf32> to vector<8x128xf32>
    %122 = arith.mulf %120, %121 : vector<8x128xf32>
    %123 = arith.maximumf %116, %122 : vector<8x128xf32>
    %124 = arith.minimumf %117, %122 : vector<8x128xf32>
    %c17 = arith.constant 17 : index
    %c0_24 = arith.constant 0 : index
    %125 = vector.load %arg4[%c17, %c0_24] : memref<32x128xf32, #tpu.memory_space<vmem>>, vector<1x128xf32>
    %126 = vector.extract_strided_slice %5 {offsets = [0, 17], sizes = [8, 1], strides = [1, 1]} : vector<8x32xf32> to vector<8x1xf32>
    %127 = vector.broadcast %126 : vector<8x1xf32> to vector<8x128xf32>
    %128 = vector.broadcast %125 : vector<1x128xf32> to vector<8x128xf32>
    %129 = arith.mulf %127, %128 : vector<8x128xf32>
    %130 = arith.maximumf %123, %129 : vector<8x128xf32>
    %131 = arith.minimumf %124, %129 : vector<8x128xf32>
    %c18 = arith.constant 18 : index
    %c0_25 = arith.constant 0 : index
    %132 = vector.load %arg4[%c18, %c0_25] : memref<32x128xf32, #tpu.memory_space<vmem>>, vector<1x128xf32>
    %133 = vector.extract_strided_slice %5 {offsets = [0, 18], sizes = [8, 1], strides = [1, 1]} : vector<8x32xf32> to vector<8x1xf32>
    %134 = vector.broadcast %133 : vector<8x1xf32> to vector<8x128xf32>
    %135 = vector.broadcast %132 : vector<1x128xf32> to vector<8x128xf32>
    %136 = arith.mulf %134, %135 : vector<8x128xf32>
    %137 = arith.maximumf %130, %136 : vector<8x128xf32>
    %138 = arith.minimumf %131, %136 : vector<8x128xf32>
    %c19 = arith.constant 19 : index
    %c0_26 = arith.constant 0 : index
    %139 = vector.load %arg4[%c19, %c0_26] : memref<32x128xf32, #tpu.memory_space<vmem>>, vector<1x128xf32>
    %140 = vector.extract_strided_slice %5 {offsets = [0, 19], sizes = [8, 1], strides = [1, 1]} : vector<8x32xf32> to vector<8x1xf32>
    %141 = vector.broadcast %140 : vector<8x1xf32> to vector<8x128xf32>
    %142 = vector.broadcast %139 : vector<1x128xf32> to vector<8x128xf32>
    %143 = arith.mulf %141, %142 : vector<8x128xf32>
    %144 = arith.maximumf %137, %143 : vector<8x128xf32>
    %145 = arith.minimumf %138, %143 : vector<8x128xf32>
    %c20 = arith.constant 20 : index
    %c0_27 = arith.constant 0 : index
    %146 = vector.load %arg4[%c20, %c0_27] : memref<32x128xf32, #tpu.memory_space<vmem>>, vector<1x128xf32>
    %147 = vector.extract_strided_slice %5 {offsets = [0, 20], sizes = [8, 1], strides = [1, 1]} : vector<8x32xf32> to vector<8x1xf32>
    %148 = vector.broadcast %147 : vector<8x1xf32> to vector<8x128xf32>
    %149 = vector.broadcast %146 : vector<1x128xf32> to vector<8x128xf32>
    %150 = arith.mulf %148, %149 : vector<8x128xf32>
    %151 = arith.maximumf %144, %150 : vector<8x128xf32>
    %152 = arith.minimumf %145, %150 : vector<8x128xf32>
    %c21 = arith.constant 21 : index
    %c0_28 = arith.constant 0 : index
    %153 = vector.load %arg4[%c21, %c0_28] : memref<32x128xf32, #tpu.memory_space<vmem>>, vector<1x128xf32>
    %154 = vector.extract_strided_slice %5 {offsets = [0, 21], sizes = [8, 1], strides = [1, 1]} : vector<8x32xf32> to vector<8x1xf32>
    %155 = vector.broadcast %154 : vector<8x1xf32> to vector<8x128xf32>
    %156 = vector.broadcast %153 : vector<1x128xf32> to vector<8x128xf32>
    %157 = arith.mulf %155, %156 : vector<8x128xf32>
    %158 = arith.maximumf %151, %157 : vector<8x128xf32>
    %159 = arith.minimumf %152, %157 : vector<8x128xf32>
    %c22 = arith.constant 22 : index
    %c0_29 = arith.constant 0 : index
    %160 = vector.load %arg4[%c22, %c0_29] : memref<32x128xf32, #tpu.memory_space<vmem>>, vector<1x128xf32>
    %161 = vector.extract_strided_slice %5 {offsets = [0, 22], sizes = [8, 1], strides = [1, 1]} : vector<8x32xf32> to vector<8x1xf32>
    %162 = vector.broadcast %161 : vector<8x1xf32> to vector<8x128xf32>
    %163 = vector.broadcast %160 : vector<1x128xf32> to vector<8x128xf32>
    %164 = arith.mulf %162, %163 : vector<8x128xf32>
    %165 = arith.maximumf %158, %164 : vector<8x128xf32>
    %166 = arith.minimumf %159, %164 : vector<8x128xf32>
    %c23 = arith.constant 23 : index
    %c0_30 = arith.constant 0 : index
    %167 = vector.load %arg4[%c23, %c0_30] : memref<32x128xf32, #tpu.memory_space<vmem>>, vector<1x128xf32>
    %168 = vector.extract_strided_slice %5 {offsets = [0, 23], sizes = [8, 1], strides = [1, 1]} : vector<8x32xf32> to vector<8x1xf32>
    %169 = vector.broadcast %168 : vector<8x1xf32> to vector<8x128xf32>
    %170 = vector.broadcast %167 : vector<1x128xf32> to vector<8x128xf32>
    %171 = arith.mulf %169, %170 : vector<8x128xf32>
    %172 = arith.maximumf %165, %171 : vector<8x128xf32>
    %173 = arith.minimumf %166, %171 : vector<8x128xf32>
    %c24 = arith.constant 24 : index
    %c0_31 = arith.constant 0 : index
    %174 = vector.load %arg4[%c24, %c0_31] : memref<32x128xf32, #tpu.memory_space<vmem>>, vector<1x128xf32>
    %175 = vector.extract_strided_slice %5 {offsets = [0, 24], sizes = [8, 1], strides = [1, 1]} : vector<8x32xf32> to vector<8x1xf32>
    %176 = vector.broadcast %175 : vector<8x1xf32> to vector<8x128xf32>
    %177 = vector.broadcast %174 : vector<1x128xf32> to vector<8x128xf32>
    %178 = arith.mulf %176, %177 : vector<8x128xf32>
    %179 = arith.maximumf %172, %178 : vector<8x128xf32>
    %180 = arith.minimumf %173, %178 : vector<8x128xf32>
    %c25 = arith.constant 25 : index
    %c0_32 = arith.constant 0 : index
    %181 = vector.load %arg4[%c25, %c0_32] : memref<32x128xf32, #tpu.memory_space<vmem>>, vector<1x128xf32>
    %182 = vector.extract_strided_slice %5 {offsets = [0, 25], sizes = [8, 1], strides = [1, 1]} : vector<8x32xf32> to vector<8x1xf32>
    %183 = vector.broadcast %182 : vector<8x1xf32> to vector<8x128xf32>
    %184 = vector.broadcast %181 : vector<1x128xf32> to vector<8x128xf32>
    %185 = arith.mulf %183, %184 : vector<8x128xf32>
    %186 = arith.maximumf %179, %185 : vector<8x128xf32>
    %187 = arith.minimumf %180, %185 : vector<8x128xf32>
    %c26 = arith.constant 26 : index
    %c0_33 = arith.constant 0 : index
    %188 = vector.load %arg4[%c26, %c0_33] : memref<32x128xf32, #tpu.memory_space<vmem>>, vector<1x128xf32>
    %189 = vector.extract_strided_slice %5 {offsets = [0, 26], sizes = [8, 1], strides = [1, 1]} : vector<8x32xf32> to vector<8x1xf32>
    %190 = vector.broadcast %189 : vector<8x1xf32> to vector<8x128xf32>
    %191 = vector.broadcast %188 : vector<1x128xf32> to vector<8x128xf32>
    %192 = arith.mulf %190, %191 : vector<8x128xf32>
    %193 = arith.maximumf %186, %192 : vector<8x128xf32>
    %194 = arith.minimumf %187, %192 : vector<8x128xf32>
    %c27 = arith.constant 27 : index
    %c0_34 = arith.constant 0 : index
    %195 = vector.load %arg4[%c27, %c0_34] : memref<32x128xf32, #tpu.memory_space<vmem>>, vector<1x128xf32>
    %196 = vector.extract_strided_slice %5 {offsets = [0, 27], sizes = [8, 1], strides = [1, 1]} : vector<8x32xf32> to vector<8x1xf32>
    %197 = vector.broadcast %196 : vector<8x1xf32> to vector<8x128xf32>
    %198 = vector.broadcast %195 : vector<1x128xf32> to vector<8x128xf32>
    %199 = arith.mulf %197, %198 : vector<8x128xf32>
    %200 = arith.maximumf %193, %199 : vector<8x128xf32>
    %201 = arith.minimumf %194, %199 : vector<8x128xf32>
    %c28 = arith.constant 28 : index
    %c0_35 = arith.constant 0 : index
    %202 = vector.load %arg4[%c28, %c0_35] : memref<32x128xf32, #tpu.memory_space<vmem>>, vector<1x128xf32>
    %203 = vector.extract_strided_slice %5 {offsets = [0, 28], sizes = [8, 1], strides = [1, 1]} : vector<8x32xf32> to vector<8x1xf32>
    %204 = vector.broadcast %203 : vector<8x1xf32> to vector<8x128xf32>
    %205 = vector.broadcast %202 : vector<1x128xf32> to vector<8x128xf32>
    %206 = arith.mulf %204, %205 : vector<8x128xf32>
    %207 = arith.maximumf %200, %206 : vector<8x128xf32>
    %208 = arith.minimumf %201, %206 : vector<8x128xf32>
    %c29 = arith.constant 29 : index
    %c0_36 = arith.constant 0 : index
    %209 = vector.load %arg4[%c29, %c0_36] : memref<32x128xf32, #tpu.memory_space<vmem>>, vector<1x128xf32>
    %210 = vector.extract_strided_slice %5 {offsets = [0, 29], sizes = [8, 1], strides = [1, 1]} : vector<8x32xf32> to vector<8x1xf32>
    %211 = vector.broadcast %210 : vector<8x1xf32> to vector<8x128xf32>
    %212 = vector.broadcast %209 : vector<1x128xf32> to vector<8x128xf32>
    %213 = arith.mulf %211, %212 : vector<8x128xf32>
    %214 = arith.maximumf %207, %213 : vector<8x128xf32>
    %215 = arith.minimumf %208, %213 : vector<8x128xf32>
    %c30 = arith.constant 30 : index
    %c0_37 = arith.constant 0 : index
    %216 = vector.load %arg4[%c30, %c0_37] : memref<32x128xf32, #tpu.memory_space<vmem>>, vector<1x128xf32>
    %217 = vector.extract_strided_slice %5 {offsets = [0, 30], sizes = [8, 1], strides = [1, 1]} : vector<8x32xf32> to vector<8x1xf32>
    %218 = vector.broadcast %217 : vector<8x1xf32> to vector<8x128xf32>
    %219 = vector.broadcast %216 : vector<1x128xf32> to vector<8x128xf32>
    %220 = arith.mulf %218, %219 : vector<8x128xf32>
    %221 = arith.maximumf %214, %220 : vector<8x128xf32>
    %222 = arith.minimumf %215, %220 : vector<8x128xf32>
    %c31 = arith.constant 31 : index
    %c0_38 = arith.constant 0 : index
    %223 = vector.load %arg4[%c31, %c0_38] : memref<32x128xf32, #tpu.memory_space<vmem>>, vector<1x128xf32>
    %224 = vector.extract_strided_slice %5 {offsets = [0, 31], sizes = [8, 1], strides = [1, 1]} : vector<8x32xf32> to vector<8x1xf32>
    %225 = vector.broadcast %224 : vector<8x1xf32> to vector<8x128xf32>
    %226 = vector.broadcast %223 : vector<1x128xf32> to vector<8x128xf32>
    %227 = arith.mulf %225, %226 : vector<8x128xf32>
    %228 = arith.maximumf %221, %227 : vector<8x128xf32>
    %229 = arith.minimumf %222, %227 : vector<8x128xf32>
    %c0_39 = arith.constant 0 : index
    %c0_40 = arith.constant 0 : index
    %230 = vector.load %arg7[%c0_39, %c0_40] : memref<8x128xf32, #tpu.memory_space<vmem>>, vector<8x128xf32>
    tpu.vector_store %arg7[%c0_39, %c0_40], %228 {strides = array<i32>} : memref<8x128xf32, #tpu.memory_space<vmem>>, vector<8x128xf32>,
    %c0_41 = arith.constant 0 : index
    %c0_42 = arith.constant 0 : index
    %231 = vector.load %arg8[%c0_41, %c0_42] : memref<8x128xf32, #tpu.memory_space<vmem>>, vector<8x128xf32>
    tpu.vector_store %arg8[%c0_41, %c0_42], %229 {strides = array<i32>} : memref<8x128xf32, #tpu.memory_space<vmem>>, vector<8x128xf32>,
    %c0_i32_43 = arith.constant 0 : i32
    %232 = arith.cmpi eq, %arg2, %c0_i32_43 : i32
    %233 = arith.extui %232 : i1 to i32
    %c0_i32_44 = arith.constant 0 : i32
    %234 = arith.cmpi ne, %233, %c0_i32_44 : i32
    scf.if %234 {
      %c0_45 = arith.constant 0 : index
      %c0_46 = arith.constant 0 : index
      %235 = vector.load %arg7[%c0_45, %c0_46] : memref<8x128xf32, #tpu.memory_space<vmem>>, vector<8x128xf32>
      %c0_47 = arith.constant 0 : index
      %c0_48 = arith.constant 0 : index
      %236 = vector.load %arg8[%c0_47, %c0_48] : memref<8x128xf32, #tpu.memory_space<vmem>>, vector<8x128xf32>
      %237 = arith.addf %235, %236 : vector<8x128xf32>
      %c0_49 = arith.constant 0 : index
      %c0_50 = arith.constant 0 : index
      %238 = vector.load %arg5[%c0_49, %c0_50] : memref<1x128xf32, #tpu.memory_space<vmem>>, vector<1x128xf32>
      %239 = vector.broadcast %238 : vector<1x128xf32> to vector<8x128xf32>
      %240 = arith.addf %237, %239 : vector<8x128xf32>
      %c0_51 = arith.constant 0 : index
      %c0_52 = arith.constant 0 : index
      %241 = vector.load %arg6[%c0_51, %c0_52] : memref<8x128xf32, #tpu.memory_space<vmem>>, vector<8x128xf32>
      tpu.vector_store %arg6[%c0_51, %c0_52], %240 {strides = array<i32>} : memref<8x128xf32, #tpu.memory_space<vmem>>, vector<8x128xf32>,
    } else {
    }
    return
  }
  func.func @transform_0(%arg0: i32, %arg1: i32, %arg2: i32) -> (i32, i32) {
    %c0_i32 = arith.constant 0 : i32
    return %arg0, %arg2 : i32, i32
  }
  func.func @transform_1(%arg0: i32, %arg1: i32, %arg2: i32) -> (i32, i32) {
    %c0_i32 = arith.constant 0 : i32
    return %arg2, %arg1 : i32, i32
  }
  func.func @transform_2(%arg0: i32, %arg1: i32, %arg2: i32) -> (i32, i32) {
    %c0_i32 = arith.constant 0 : i32
    %c0_i32_0 = arith.constant 0 : i32
    return %c0_i32, %arg1 : i32, i32
  }
  func.func @transform_3(%arg0: i32, %arg1: i32, %arg2: i32) -> (i32, i32) {
    %c0_i32 = arith.constant 0 : i32
    return %arg0, %arg1 : i32, i32
  }
}

</mosaic_0001>

<bundles_post_ra>
// kernel: tpu_custom_call.1
= control target key start
LH: loop header
LB: loop body
LE: loop exit
PB: predicated region body
PF: predicated region fallthrough
CT: control target
= control target key end

     0   :  { %8 = vsyncpa [#allocation5], 0  ;;  %s1380_s0 = inlined_call_operand.hbm [shape: f32[16,32], index: 0, kind: input, shape index: {}]   ;;  %s1381_s1 = inlined_call_operand.hbm [shape: f32[32,128], index: 1, kind: input, shape index: {}]   ;;  %s1382_s2 = inlined_call_operand.vmem [shape: f32[1,128], index: 2, kind: input, shape index: {}]   ;;  %s1383_s3 = inlined_call_operand.hbm [shape: f32[16,128], index: 3, kind: output, shape index: {}]  }
   0x1   :  { %10 = vsyncpa [#allocation5 + $0x1], 0 }
   0x2   :  { %11 = vsyncpa [#allocation8], 0 }
   0x3   :  { %12 = vsyncpa [#allocation6], 0 }
   0x4   :  { %14 = vsyncpa [#allocation6 + $0x1], 0  ;;  %s1172_s12 = smov 0   ;;  %s1174_s13 = smov 0  }
   0x5   :  { %s1176_s14 = smov 0   ;;  %s1178_s15 = smov 0  }
   0x6   :  { %s1180_s16 = smov 0   ;;  %s1182_s17 = smov 0  }
   0x7 LB: > { %s786_s18 = sadd.s32 4294967295, %s1113_s17   ;;  %s787_s19 = sadd.s32 4294967294, %s1113_s17   ;;  %s1113_s17 = sphi %s1182_s17, %s20_s17   ;;  %s1109_s16 = sphi %s1180_s16, %s1401_s16   ;;  %s1105_s15 = sphi %s1178_s15, %s1400_s15   ;;  %s1101_s14 = sphi %s1176_s14, %s1399_s14   ;;  %s1097_s13 = sphi %s1174_s13, %s1398_s13   ;;  %s1093_s12 = sphi %s1172_s12, %s1397_s12  }
   0x8   : > { %p61_p0 = scmp.ne.s32.totalorder %s1097_s13, %s1093_s12  ;;  %p1206_p1 = scmp.eq.s32.totalorder %s786_s18, 0 }
   0x9   : > { %p1210_p2 = scmp.eq.s32.totalorder %s786_s18, 1  ;;  %p147_p3 = scmp.eq.s32.totalorder %s787_s19, 1 }
   0xa   : > { %p1216_p4 = por %p1206_p1, %p61_p0  ;;  %p788_p5 = scmp.ge.s32.totalorder %s1113_s17, 1 }
   0xb   : > { %p1221_p6 = por %p147_p3, %p61_p0  ;;  %p154_p7 = scmp.lt.s32.totalorder %s1113_s17, 3 }
   0xc   : > { %s1387_s22 = scalar_select %p1216_p4, 1, 0 }
   0xd   : > { %s1388_s23 = scalar_select %p1221_p6, 1, 0 }
   0xe   : > { %p1226_p8 = pnand %p788_p5, %p154_p7  ;;  %s1115_s25 = smov [#allocation7]  }
   0xf   : > { %s170_s26 = sshll.u32 %s1115_s25, 4  ;;  %s39_s28 = sadd.s32 1, %s1109_s16  ;;  %s171_s26 = int_to_ptr.vmem [resolvable:$true] %s170_s26 }
  0x10   : > { %p843_p9 = pneg %p1226_p8  ;;  %s986_s29 = scalar_lea.vmem %s171_s26, 512 }
  0x11   : > { %p987_p13 = scmp.ne.s32.totalorder %s171_s26, %s986_s29  ;;  %p994_p5 = scmp.lt.s32.totalorder %s171_s26, %s171_s26 }
  0x12   : > { %p1235_p11 = pnand %p843_p9, %p1206_p1  ;;  %p995_p7 = scmp.lt.s32.totalorder %s986_s29, %s986_s29 }
  0x14   : > { %p977_p12 = pneg %p1235_p11  ;;  %p996_p6 = por %p995_p7, %p994_p5 }
  0x16   : > { %p989_p0 = pnand %p987_p13, %p977_p12 }
  0x18   : > { %p990_p3 = pneg %p989_p0 }
  0x1a   : > { %p997_p4 = pnand %p996_p6, %p990_p3 }
  0x1c   : > { %1000 = shalt.err (!%p997_p4)
}
  0x1d   : > { %s1116_s30 = smov 128   ;;  %s1117_s4 = smov 8  }
  0x1e   : > { %846 = dma.hbm_to_vmem [thread:$0]  (!%p1235_p11), %s1381_s1, 512, %s171_s26, [#allocation8], %s1116_s30, %s1116_s30, %s1117_s4  }
  0x1f   : > { %p41_p6 = scmp.ge.s32.totalorder %s39_s28, 2  ;;  %s48_s7 = sadd.s32 1, %s1101_s14 }
  0x20   : > { %p55_p4 = scmp.ne.s32.totalorder %s1101_s14, %s1097_s13  ;;  %p56_p9 = scmp.eq.s32.totalorder %s1113_s17, 0 }
  0x21   : > { %s1403_s28 = smov (%p41_p6, %s39_s28), 0  ;;  %p856_p0 = scmp.lt.s32.totalorder %s1113_s17, 2 }
  0x22   : > { %p1253_p12 = por %p56_p9, %p55_p4  ;;  %p1259_p13 = por %p1210_p2, %p55_p4 }
  0x23   : > { %s43_s10 = ssub.s32 %s1109_s16, %s1403_s28  ;;  %s190_s11 = sand.u32 1, %s1101_s14  }
  0x24   : > { %p46_p11 = scmp.eq.s32.totalorder %s43_s10, 0  ;;  %s792_s18 = sshll.u32 %s190_s11, 3 }
  0x25   : > { %s793_s25 = sshll.u32 %s1109_s16, 7  ;;  %s194_s30 = scalar_lea.vmem [#allocation4], %s792_s18 }
  0x26   : > { %s1268_s19 = scalar_select %p46_p11, %s1101_s14, %s48_s7  }
  0x27   : > { %s200_s29 = scalar_lea.hbm %s1380_s0, %s793_s25  ;;  %s202_s4 = sshll.u32 %s194_s30, 4  ;;  %s203_s4 = int_to_ptr.vmem [resolvable:$true] %s202_s4 }
  0x28   : > { %p1276_p2 = pnand %p856_p0, %p1253_p12  ;;  %s191_s5 = scalar_lea.sflag [#allocation5], %s190_s11 }
  0x29   : > { %s1014_s6 = scalar_lea.vmem %s203_s4, 128  ;;  %s1118_s7 = smov [#allocation4]  }
  0x2a   : > { %p1003_p3 = pneg %p1276_p2  ;;  %p1015_p5 = scmp.ne.s32.totalorder %s203_s4, %s1014_s6 }
  0x2b   : > { %s1019_s10 = sshll.u32 %s1118_s7, 4  ;;  %s1020_s10 = int_to_ptr.vmem [resolvable:$false] %s1019_s10 }
  0x2c   : > { %p1017_p7 = pnand %p1015_p5, %p1003_p3  ;;  %s1021_s25 = scalar_lea.vmem %s1020_s10, 256 }
  0x2d   : > { %p1022_p4 = scmp.lt.s32.totalorder %s203_s4, %s1020_s10  ;;  %p1023_p9 = scmp.lt.s32.totalorder %s1021_s25, %s1014_s6 }
  0x2e   : > { %p1018_p6 = pneg %p1017_p7 }
  0x2f   : > { %p1024_p11 = por %p1023_p9, %p1022_p4 }
  0x31   : > { %p1025_p10 = pnand %p1024_p11, %p1018_p6 }
  0x33   : > { %1028 = shalt.err (!%p1025_p10)
}
  0x34   : > { %850 = dma.hbm_to_vmem [thread:$0]  (!%p1276_p2), %s200_s29, 128, %s203_s4, %s191_s5  }
  0x35   : > { %211 = sbr.rel (%p1226_p8) target bundleno = 308 (0x134), region = 32  ;;  %s1287_s8 = sand.u32 (!%p1226_p8), 1, %s1097_s13  }
  0x36   : > { %s795_s11 = sshll.u32 (!%p1226_p8), %s1287_s8, 3  ;;  %s214_s18 = scalar_lea.sflag (!%p1226_p8), [#allocation5], %s1287_s8 }
  0x37   : > { %s217_s26 = scalar_lea.vmem (!%p1226_p8), [#allocation4], %s795_s11  ;;  %p1394_p12 = scmp.ne.s32.totalorder (!%p1226_p8), %s1387_s22, 0 }
  0x3a   : > { %1080 = dma.done.wait (%p1394_p12), %s214_s18, 128  }
  0x3b   : > { %1082 = vsyncadd (%p1394_p12), %s214_s18, 4294967168 }
  0x3c   : > { %1084 = dma.done.wait (%p1206_p1), [#allocation8], 512  }
  0x3d   : > { %1086 = vsyncadd (%p1206_p1), [#allocation8], 4294966784  ;;  %v1119_v0 = vmov 2   ;;  %v1120_v1 = vmov 0   ;;  %v1301_v2 = vld [vmem:[%s217_s26] sm:$0xff]  ;;  %v1121_v3 = vmov 3  }
  0x3e   : > { %944 = vset.pattern.permute.xlu1 %v1119_v0  ;;  %942 = vset.pattern.permute.xlu0 %v1120_v1  ;;  %v1122_v4 = vmov 1   ;;  %v1123_v5 = vmov 4   ;;  %v1124_v6 = vmov 5   ;;  %v1125_v7 = vmov 6   ;;  %v798_v35 = vld [vmem:[#allocation7] ss:$0 sm:$0xff] }
  0x3f   : > { %287 = vperm.xlu1 %944, %v1301_v2   ;;  %263 = vperm.xlu0 %942, %v1301_v2   ;;  %v1126_v8 = vmov 8   ;;  %v1127_v9 = vmov 7   ;;  %v1128_v10 = vmov 11   ;;  %v1129_v11 = vmov 9   ;;  %v799_v36 = vld [vmem:[#allocation7 + $0x1] ss:$0 sm:$0xff] }
  0x40   : > { %v1130_v12 = vmov 14   ;;  %v1131_v13 = vmov 10   ;;  %v1132_v14 = vmov 17   ;;  %v1133_v15 = vmov 12   ;;  %v800_v38 = vld [vmem:[#allocation7 + $0x2] ss:$0 sm:$0xff] }
  0x41   : > { %v1134_v16 = vmov 20   ;;  %v1135_v17 = vmov 13   ;;  %v1136_v18 = vmov 23   ;;  %v1137_v19 = vmov 15   ;;  %v801_v42 = vld [vmem:[#allocation7 + $0x3] ss:$0 sm:$0xff] }
  0x42   : > { %v1138_v20 = vmov 26   ;;  %v1139_v21 = vmov 16   ;;  %v1140_v22 = vmov 29   ;;  %v1141_v23 = vmov 18   ;;  %v802_v46 = vld [vmem:[#allocation7 + $0x4] ss:$0 sm:$0xff] }
  0x43   : > { %945 = vset.pattern.permute.xlu1 %v1121_v3  ;;  %943 = vset.pattern.permute.xlu0 %v1122_v4  ;;  %v1142_v24 = vmov 31   ;;  %v1143_v25 = vmov 19   ;;  %v1144_v26 = vmov 21   ;;  %v1145_v27 = vmov 22   ;;  %v803_v51 = vld [vmem:[#allocation7 + $0x5] ss:$0 sm:$0xff] }
  0x44   : > { %299 = vperm.xlu1 %945, %v1301_v2   ;;  %275 = vperm.xlu0 %943, %v1301_v2   ;;  %v1146_v28 = vmov 24   ;;  %v1147_v29 = vmov 25   ;;  %v1148_v30 = vmov 27   ;;  %v1149_v31 = vmov 28   ;;  %v804_v59 = vld [vmem:[#allocation7 + $0x6] ss:$0 sm:$0xff] }
  0x45   : > { %v1150_v32 = vmov 30   ;;  %v805_v0 = vld [vmem:[#allocation7 + $0x7] ss:$0 sm:$0xff]  ;;  %s832_s24 = sshll.u32 %s1105_s15, 7  ;;  %s246_s27 = scalar_lea.vmem [#allocation9], %s795_s11 }
  0x46   : > { %s677_s29 = sshll.u32 %s246_s27, 4  ;;  %s675_s21 = scalar_lea.hbm %s1383_s3, %s832_s24  ;;  %s678_s29 = int_to_ptr.vmem [resolvable:$true] %s677_s29 }
  0x47   : > { %s663_s5 = scalar_lea.sflag [#allocation6], %s1287_s8  ;;  %s1029_s6 = scalar_lea.vmem %s678_s29, 128 }
  0x48   : > { %946 = vset.pattern.permute.xlu1 %v1123_v5  ;;  %947 = vset.pattern.permute.xlu0 %v1124_v6  ;;  %p1030_p1 = scmp.ne.s32.totalorder %s678_s29, %s1029_s6  ;;  %s1151_s7 = smov [#allocation9]  }
  0x49   : > { %311 = vperm.xlu1 %946, %v1301_v2   ;;  %323 = vperm.xlu0 %947, %v1301_v2   ;;  %s1033_s10 = sshll.u32 %s1151_s7, 4  ;;  %s1034_s10 = int_to_ptr.vmem [resolvable:$false] %s1033_s10 }
  0x4a   : > { %p1031_p8 = pnand %p1030_p1, %p1259_p13  ;;  %s1035_s15 = scalar_lea.vmem %s1034_s10, 256 }
  0x4b   : > { %p1036_p0 = scmp.lt.s32.totalorder %s678_s29, %s1034_s10  ;;  %p1037_p2 = scmp.lt.s32.totalorder %s1035_s15, %s1029_s6 }
  0x4c   : > { %p1032_p10 = pneg %p1031_p8 }
  0x4d   : > { %948 = vset.pattern.permute.xlu1 %v1125_v7  ;;  %950 = vset.pattern.permute.xlu0 %v1126_v8  ;;  %p1038_p3 = por %p1037_p2, %p1036_p0 }
  0x4e   : > { %335 = vperm.xlu1 %948, %v1301_v2   ;;  %359 = vperm.xlu0 %950, %v1301_v2  }
  0x4f   : > { %p1039_p5 = pnand %p1038_p3, %p1032_p10 }
  0x52   : > { %949 = vset.pattern.permute.xlu1 %v1127_v9  ;;  %953 = vset.pattern.permute.xlu0 %v1128_v10  ;;  %v807_v10 = vld [vmem:[#allocation7 + $0x9] ss:$0 sm:$0xff] }
  0x53   : > { %347 = vperm.xlu1 %949, %v1301_v2   ;;  %395 = vperm.xlu0 %953, %v1301_v2  }
  0x57   : > { %951 = vset.pattern.permute.xlu1 %v1129_v11  ;;  %956 = vset.pattern.permute.xlu0 %v1130_v12 }
  0x58   : > { %371 = vperm.xlu1 %951, %v1301_v2   ;;  %431 = vperm.xlu0 %956, %v1301_v2  }
  0x5c   : > { %952 = vset.pattern.permute.xlu1 %v1131_v13  ;;  %959 = vset.pattern.permute.xlu0 %v1132_v14 }
  0x5d   : > { %383 = vperm.xlu1 %952, %v1301_v2   ;;  %467 = vperm.xlu0 %959, %v1301_v2  }
  0x61   : > { %954 = vset.pattern.permute.xlu1 %v1133_v15  ;;  %962 = vset.pattern.permute.xlu0 %v1134_v16  ;;  %v808_v15 = vld [vmem:[#allocation7 + $0xa] ss:$0 sm:$0xff] }
  0x62   : > { %407 = vperm.xlu1 %954, %v1301_v2   ;;  %503 = vperm.xlu0 %962, %v1301_v2  }
  0x66   : > { %955 = vset.pattern.permute.xlu1 %v1135_v17  ;;  %965 = vset.pattern.permute.xlu0 %v1136_v18  ;;  %v809_v17 = vld [vmem:[#allocation7 + $0xb] ss:$0 sm:$0xff] }
  0x67   : > { %419 = vperm.xlu1 %955, %v1301_v2   ;;  %539 = vperm.xlu0 %965, %v1301_v2  }
  0x6b   : > { %957 = vset.pattern.permute.xlu1 %v1137_v19  ;;  %968 = vset.pattern.permute.xlu0 %v1138_v20 }
  0x6c   : > { %443 = vperm.xlu1 %957, %v1301_v2   ;;  %575 = vperm.xlu0 %968, %v1301_v2  }
  0x70   : > { %958 = vset.pattern.permute.xlu1 %v1139_v21  ;;  %971 = vset.pattern.permute.xlu0 %v1140_v22 }
  0x71   : > { %455 = vperm.xlu1 %958, %v1301_v2   ;;  %611 = vperm.xlu0 %971, %v1301_v2  }
  0x75   : > { %960 = vset.pattern.permute.xlu1 %v1141_v23  ;;  %974 = vset.pattern.permute.xlu0 %v1142_v24 }
  0x76   : > { %479 = vperm.xlu1 %960, %v1301_v2  }
  0x7a   : > { %961 = vset.pattern.permute.xlu1 %v1143_v25  ;;  %v810_v25 = vld [vmem:[#allocation7 + $0xc] ss:$0 sm:$0xff] }
  0x7b   : > { %491 = vperm.xlu1 %961, %v1301_v2  }
  0x7f   : > { %963 = vset.pattern.permute.xlu1 %v1144_v26 }
  0x80   : > { %515 = vperm.xlu1 %963, %v1301_v2  }
  0x84   : > { %964 = vset.pattern.permute.xlu1 %v1145_v27 }
  0x85   : > { %527 = vperm.xlu1 %964, %v1301_v2  }
  0x89   : > { %966 = vset.pattern.permute.xlu1 %v1146_v28 }
  0x8a   : > { %551 = vperm.xlu1 %966, %v1301_v2  }
  0x8e   : > { %967 = vset.pattern.permute.xlu1 %v1147_v29 }
  0x8f   : > { %563 = vperm.xlu1 %967, %v1301_v2  }
  0x93   : > { %969 = vset.pattern.permute.xlu1 %v1148_v30  ;;  %v811_v30 = vld [vmem:[#allocation7 + $0xd] ss:$0 sm:$0xff] }
  0x94   : > { %587 = vperm.xlu1 %969, %v1301_v2  }
  0x98   : > { %970 = vset.pattern.permute.xlu1 %v1149_v31 }
  0x99   : > { %599 = vperm.xlu1 %970, %v1301_v2  }
  0x9d   : > { %972 = vset.pattern.permute.xlu1 %v1150_v32  ;;  %v812_v32 = vld [vmem:[#allocation7 + $0xe] ss:$0 sm:$0xff] }
  0x9e   : > { %623 = vperm.xlu1 %972, %v1301_v2  }
  0xa2   : > { %973 = vset.pattern.permute.xlu1 %v1142_v24 }
  0xa3   : > { %635 = vperm.xlu1 %973, %v1301_v2   ;;  %v806_v2 = vld [vmem:[#allocation7 + $0x8] ss:$0 sm:$0xff] }
  0xba   : > { %v288_v33 = vpop.permute.xlu1 %287  ;;  %v264_v34 = vpop.permute.xlu0 %263 }
  0xbb   : > { %v270_v37 = vmul.f32 %v798_v35, %v264_v34  ;;  %v294_v43 = vmul.f32 %v800_v38, %v288_v33 }
  0xbf   : > { %v300_v39 = vpop.permute.xlu1 %299  ;;  %v276_v40 = vpop.permute.xlu0 %275 }
  0xc0   : > { %v282_v41 = vmul.f32 %v799_v36, %v276_v40  ;;  %v306_v47 = vmul.f32 %v801_v42, %v300_v39  ;;  %v813_v40 = vld [vmem:[#allocation7 + $0xf] ss:$0 sm:$0xff] }
  0xc2   : > { %v283_v44 = vmax.f32 %v270_v37, %v282_v41  ;;  %v284_v45 = vmin.f32 %v270_v37, %v282_v41 }
  0xc4   : > { %v295_v48 = vmax.f32 %v283_v44, %v294_v43  ;;  %v296_v49 = vmin.f32 %v284_v45, %v294_v43  ;;  %v312_v50 = vpop.permute.xlu1 %311  ;;  %v324_v52 = vpop.permute.xlu0 %323  ;;  %v814_v45 = vld [vmem:[#allocation7 + $0x10] ss:$0 sm:$0xff] }
  0xc5   : > { %v318_v53 = vmul.f32 %v802_v46, %v312_v50  ;;  %v330_v56 = vmul.f32 %v803_v51, %v324_v52 }
  0xc6   : > { %v307_v54 = vmax.f32 %v295_v48, %v306_v47  ;;  %v308_v55 = vmin.f32 %v296_v49, %v306_v47  ;;  %v815_v47 = vld [vmem:[#allocation7 + $0x11] ss:$0 sm:$0xff] }
  0xc8   : > { %v319_v57 = vmax.f32 %v307_v54, %v318_v53  ;;  %v320_v58 = vmin.f32 %v308_v55, %v318_v53  ;;  %v816_v55 = vld [vmem:[#allocation7 + $0x12] ss:$0 sm:$0xff] }
  0xc9   : > { %v336_v60 = vpop.permute.xlu1 %335  ;;  %v360_v3 = vpop.permute.xlu0 %359 }
  0xca   : > { %v331_v61 = vmax.f32 %v319_v57, %v330_v56  ;;  %v332_v62 = vmin.f32 %v320_v58, %v330_v56  ;;  %v342_v63 = vmul.f32 %v804_v59, %v336_v60  ;;  %v366_v9 = vmul.f32 %v806_v2, %v360_v3  ;;  %v817_v60 = vld [vmem:[#allocation7 + $0x13] ss:$0 sm:$0xff] }
  0xcc   : > { %v343_v4 = vmax.f32 %v331_v61, %v342_v63  ;;  %v344_v5 = vmin.f32 %v332_v62, %v342_v63  ;;  %v818_v62 = vld [vmem:[#allocation7 + $0x14] ss:$0 sm:$0xff] }
  0xce   : > { %v348_v1 = vpop.permute.xlu1 %347  ;;  %v396_v18 = vpop.permute.xlu0 %395 }
  0xcf   : > { %v354_v6 = vmul.f32 %v805_v0, %v348_v1  ;;  %v402_v24 = vmul.f32 %v809_v17, %v396_v18 }
  0xd1   : > { %v355_v7 = vmax.f32 %v343_v4, %v354_v6  ;;  %v356_v8 = vmin.f32 %v344_v5, %v354_v6  ;;  %v819_v6 = vld [vmem:[#allocation7 + $0x15] ss:$0 sm:$0xff] }
  0xd3   : > { %v372_v11 = vpop.permute.xlu1 %371  ;;  %v367_v12 = vmax.f32 %v355_v7, %v366_v9  ;;  %v368_v13 = vmin.f32 %v356_v8, %v366_v9  ;;  %v432_v33 = vpop.permute.xlu0 %431 }
  0xd4   : > { %v378_v14 = vmul.f32 %v807_v10, %v372_v11  ;;  %v438_v39 = vmul.f32 %v812_v32, %v432_v33  ;;  %v820_v11 = vld [vmem:[#allocation7 + $0x16] ss:$0 sm:$0xff] }
  0xd6   : > { %v379_v19 = vmax.f32 %v367_v12, %v378_v14  ;;  %v380_v20 = vmin.f32 %v368_v13, %v378_v14  ;;  %v821_v13 = vld [vmem:[#allocation7 + $0x17] ss:$0 sm:$0xff] }
  0xd8   : > { %v384_v16 = vpop.permute.xlu1 %383  ;;  %v468_v48 = vpop.permute.xlu0 %467 }
  0xd9   : > { %v390_v21 = vmul.f32 %v808_v15, %v384_v16  ;;  %v474_v54 = vmul.f32 %v815_v47, %v468_v48 }
  0xdb   : > { %v391_v22 = vmax.f32 %v379_v19, %v390_v21  ;;  %v392_v23 = vmin.f32 %v380_v20, %v390_v21  ;;  %v822_v21 = vld [vmem:[#allocation7 + $0x18] ss:$0 sm:$0xff] }
  0xdd   : > { %v408_v26 = vpop.permute.xlu1 %407  ;;  %v403_v27 = vmax.f32 %v391_v22, %v402_v24  ;;  %v404_v28 = vmin.f32 %v392_v23, %v402_v24  ;;  %v504_v63 = vpop.permute.xlu0 %503 }
  0xde   : > { %v414_v29 = vmul.f32 %v810_v25, %v408_v26  ;;  %v510_v5 = vmul.f32 %v818_v62, %v504_v63  ;;  %v823_v26 = vld [vmem:[#allocation7 + $0x19] ss:$0 sm:$0xff]  ;;  %v830_v63 = vld [vmem:[%s1382_s2] ss:$0 sm:$0xff] }
  0xe0   : > { %v415_v34 = vmax.f32 %v403_v27, %v414_v29  ;;  %v416_v35 = vmin.f32 %v404_v28, %v414_v29  ;;  %v824_v28 = vld [vmem:[#allocation7 + $0x1a] ss:$0 sm:$0xff] }
  0xe2   : > { %v420_v31 = vpop.permute.xlu1 %419  ;;  %v540_v14 = vpop.permute.xlu0 %539 }
  0xe3   : > { %v426_v36 = vmul.f32 %v811_v30, %v420_v31  ;;  %v546_v20 = vmul.f32 %v821_v13, %v540_v14 }
  0xe5   : > { %v427_v37 = vmax.f32 %v415_v34, %v426_v36  ;;  %v428_v38 = vmin.f32 %v416_v35, %v426_v36  ;;  %v825_v36 = vld [vmem:[#allocation7 + $0x1b] ss:$0 sm:$0xff] }
  0xe7   : > { %v444_v41 = vpop.permute.xlu1 %443  ;;  %v439_v42 = vmax.f32 %v427_v37, %v438_v39  ;;  %v440_v43 = vmin.f32 %v428_v38, %v438_v39  ;;  %v576_v29 = vpop.permute.xlu0 %575 }
  0xe8   : > { %v450_v44 = vmul.f32 %v813_v40, %v444_v41  ;;  %v582_v35 = vmul.f32 %v824_v28, %v576_v29  ;;  %v826_v41 = vld [vmem:[#allocation7 + $0x1c] ss:$0 sm:$0xff] }
  0xea   : > { %v451_v49 = vmax.f32 %v439_v42, %v450_v44  ;;  %v452_v50 = vmin.f32 %v440_v43, %v450_v44  ;;  %v827_v43 = vld [vmem:[#allocation7 + $0x1d] ss:$0 sm:$0xff] }
  0xec   : > { %v456_v46 = vpop.permute.xlu1 %455  ;;  %v612_v44 = vpop.permute.xlu0 %611 }
  0xed   : > { %v462_v51 = vmul.f32 %v814_v45, %v456_v46 }
  0xef   : > { %v463_v52 = vmax.f32 %v451_v49, %v462_v51  ;;  %v464_v53 = vmin.f32 %v452_v50, %v462_v51  ;;  %v618_v50 = vmul.f32 %v827_v43, %v612_v44  ;;  %v828_v51 = vld [vmem:[#allocation7 + $0x1e] ss:$0 sm:$0xff] }
  0xf1   : > { %v480_v56 = vpop.permute.xlu1 %479  ;;  %v475_v57 = vmax.f32 %v463_v52, %v474_v54  ;;  %v476_v58 = vmin.f32 %v464_v53, %v474_v54 }
  0xf2   : > { %v486_v59 = vmul.f32 %v816_v55, %v480_v56  ;;  %v829_v56 = vld [vmem:[#allocation7 + $0x1f] ss:$0 sm:$0xff] }
  0xf4   : > { %v487_v0 = vmax.f32 %v475_v57, %v486_v59  ;;  %v488_v1 = vmin.f32 %v476_v58, %v486_v59 }
  0xf6   : > { %v492_v61 = vpop.permute.xlu1 %491 }
  0xf7   : > { %v498_v2 = vmul.f32 %v817_v60, %v492_v61 }
  0xf9   : > { %v499_v3 = vmax.f32 %v487_v0, %v498_v2  ;;  %v500_v4 = vmin.f32 %v488_v1, %v498_v2 }
  0xfb   : > { %v516_v7 = vpop.permute.xlu1 %515  ;;  %v511_v8 = vmax.f32 %v499_v3, %v510_v5  ;;  %v512_v9 = vmin.f32 %v500_v4, %v510_v5 }
  0xfc   : > { %v522_v10 = vmul.f32 %v819_v6, %v516_v7 }
  0xfe   : > { %v523_v15 = vmax.f32 %v511_v8, %v522_v10  ;;  %v524_v16 = vmin.f32 %v512_v9, %v522_v10 }
 0x100   : > { %v528_v12 = vpop.permute.xlu1 %527 }
 0x101   : > { %v534_v17 = vmul.f32 %v820_v11, %v528_v12 }
 0x103   : > { %v535_v18 = vmax.f32 %v523_v15, %v534_v17  ;;  %v536_v19 = vmin.f32 %v524_v16, %v534_v17 }
 0x105   : > { %v552_v22 = vpop.permute.xlu1 %551  ;;  %v547_v23 = vmax.f32 %v535_v18, %v546_v20  ;;  %v548_v24 = vmin.f32 %v536_v19, %v546_v20 }
 0x106   : > { %v558_v25 = vmul.f32 %v822_v21, %v552_v22 }
 0x108   : > { %v559_v30 = vmax.f32 %v547_v23, %v558_v25  ;;  %v560_v31 = vmin.f32 %v548_v24, %v558_v25 }
 0x10a   : > { %v564_v27 = vpop.permute.xlu1 %563 }
 0x10b   : > { %v570_v32 = vmul.f32 %v823_v26, %v564_v27 }
 0x10d   : > { %v571_v33 = vmax.f32 %v559_v30, %v570_v32  ;;  %v572_v34 = vmin.f32 %v560_v31, %v570_v32 }
 0x10f   : > { %v588_v37 = vpop.permute.xlu1 %587  ;;  %v583_v38 = vmax.f32 %v571_v33, %v582_v35  ;;  %v584_v39 = vmin.f32 %v572_v34, %v582_v35 }
 0x110   : > { %v594_v40 = vmul.f32 %v825_v36, %v588_v37 }
 0x112   : > { %v595_v45 = vmax.f32 %v583_v38, %v594_v40  ;;  %v596_v46 = vmin.f32 %v584_v39, %v594_v40 }
 0x114   : > { %v600_v42 = vpop.permute.xlu1 %599 }
 0x115   : > { %v606_v47 = vmul.f32 %v826_v41, %v600_v42 }
 0x117   : > { %v607_v48 = vmax.f32 %v595_v45, %v606_v47  ;;  %v608_v49 = vmin.f32 %v596_v46, %v606_v47 }
 0x119   : > { %v624_v52 = vpop.permute.xlu1 %623  ;;  %v619_v53 = vmax.f32 %v607_v48, %v618_v50  ;;  %v620_v54 = vmin.f32 %v608_v49, %v618_v50 }
 0x11a   : > { %v630_v55 = vmul.f32 %v828_v51, %v624_v52 }
 0x11c   : > { %v631_v58 = vmax.f32 %v619_v53, %v630_v55  ;;  %v632_v59 = vmin.f32 %v620_v54, %v630_v55 }
 0x11e   : > { %v636_v57 = vpop.permute.xlu1 %635 }
 0x11f   : > { %v642_v60 = vmul.f32 %v829_v56, %v636_v57 }
 0x121   : > { %v643_v61 = vmax.f32 %v631_v58, %v642_v60  ;;  %v644_v62 = vmin.f32 %v632_v59, %v642_v60 }
 0x123   : > { %v652_v0 = vadd.f32 %v644_v62, %v643_v61 }
 0x125   : > { %v660_v1 = vadd.f32 %v830_v63, %v652_v0 }
 0x127   : > { %661 = vst [vmem:[%s246_s27] sm:$0xff] %v660_v1 }
 0x128   : > { %1042 = shalt.err (!%p1039_p5)
}
 0x129   : > { %s1043_s25 = scalar_lea.hbm %s675_s21, 128  ;;  %s1047_s18 = scalar_lea.hbm %s1383_s3, 256 }
 0x12a   : > { %p1044_p7 = scmp.ne.s32.totalorder %s675_s21, %s1043_s25  ;;  %p1048_p9 = scmp.lt.s32.totalorder %s675_s21, %s1383_s3 }
 0x12b   : > { %p1049_p11 = scmp.lt.s32.totalorder %s1047_s18, %s1043_s25 }
 0x12c   : > { %p1045_p6 = pnand %p1044_p7, %p1259_p13 }
 0x12d   : > { %p1050_p12 = por %p1049_p11, %p1048_p9 }
 0x12e   : > { %p1046_p4 = pneg %p1045_p6 }
 0x130   : > { %p1051_p1 = pnand %p1050_p12, %p1046_p4 }
 0x132   : > { %1054 = shalt.err (!%p1051_p1)
}
 0x133   : > { %841 = dma.vmem_to_hbm [thread:$0]  (%p1259_p13), %s678_s29, 128, %s675_s21, %s663_s5  }
 0x134 PF: > { %s689_s22 = sand.u32 1, %s1093_s12   ;;  %p1395_p8 = scmp.ne.s32.totalorder %s1388_s23, 0 }
 0x135   : > { %p1396_p10 = scmp.ge.s32.totalorder %s1113_s17, 2  ;;  %s690_s24 = scalar_lea.sflag [#allocation6], %s689_s22 }
 0x137   : > { %p852_p0 = pnand %p1396_p10, %p1395_p8 }
 0x139   : > { %p853_p2 = pneg %p852_p0 }
 0x13b   : > { %1088 = dma.done.wait (%p853_p2), %s690_s24, 128  }
 0x13c   : > { %1090 = vsyncadd (%p853_p2), %s690_s24, 4294967168  ;;  %s20_s17 = sadd.s32 1, %s1113_s17   ;;  %s1397_s12 = smov %s1097_s13 }
 0x13d   : > { %p17_p3 = scmp.ge.s32.totalorder %s20_s17, 4   ;;  %s1398_s13 = smov %s1101_s14 }
 0x13e   : > { %s1399_s14 = smov %s1268_s19  ;;  %s1400_s15 = smov %s1109_s16 }
 0x13f   : > { %s1401_s16 = smov %s1403_s28  ;;  %19 = sbr.rel (!%p17_p3) target bundleno = 7 (0x7), region = 93 }
 0x144   :  { %695 = vsyncpa [#allocation5], 1 }
 0x145   :  { %697 = vsyncpa [#allocation5 + $0x1], 1 }
 0x146   :  { %698 = vsyncpa [#allocation8], 1 }
 0x147   :  { %699 = vsyncpa [#allocation6], 1 }
 0x148   :  { %701 = vsyncpa [#allocation6 + $0x1], 1 }

</bundles_post_ra>
